<compile_context>
chip_gen: v7x
topology: tpu7x:2x2x1
jax: 0.10.0
libtpu: 0.0.40
codegen_flags: <defaults>
</compile_context>

<pallas_src>
import functools

import jax
import jax.numpy as jnp
from jax.experimental import pallas as pl
from jax.experimental.pallas import tpu as pltpu

LANES = 128


def _rmse_partial_kernel(yhat_ref, y_ref, o_ref, *, valid_rows, need_mask):
    """Accumulate per-(sublane, lane) partial sums of (yhat - y)^2 into o_ref.

    Grid = (split, steps). The leading axis is 'parallel' (one resident output
    block per split -> per-TensorCore partials on v7x); the trailing axis is
    the 'arbitrary' reduction over row-tiles with o_ref used as accumulator.
    """
    j = pl.program_id(1)

    @pl.when(j == 0)
    def _init():
        o_ref[...] = jnp.zeros_like(o_ref)

    # Native-dtype tiles were DMA'd; upcast to f32 on the VPU (free vs HBM).
    d = yhat_ref[...].astype(jnp.float32) - y_ref[...].astype(jnp.float32)
    sq = d * d

    if need_mask:
        # Zero out rows past the true (padded) row count. Using the LOGICAL
        # block position means a clamped duplicate block is fully masked and
        # the partial tail block's stale VMEM rows contribute nothing.
        tile_rows = sq.shape[0]
        row0 = (pl.program_id(0) * pl.num_programs(1) + j) * tile_rows
        row_ids = jax.lax.broadcasted_iota(jnp.int32, sq.shape, 0) + row0
        sq = jnp.where(row_ids < valid_rows, sq, 0.0)

    # Full-vreg (8,128) accumulation: unmasked VALU adds every step; all
    # cross-sublane / cross-lane reduction is deferred to the wrapper epilogue.
    partial = jnp.sum(sq.reshape(-1, 8, LANES), axis=0)        # (8, 128) f32
    o_ref[...] += partial.reshape(1, 8, LANES)


def _round_up(x, m):
    return ((x + m - 1) // m) * m


def _default_tile_rows():
    """Generation-tuned row tile (per-input block = tile_rows*128*itemsize)."""
    try:
        kind = jax.devices()[0].device_kind.lower()
    except Exception:
        return 8192
    if "v5 lite" in kind or "v5e" in kind or "v5lite" in kind:
        return 4096       # ~0.8 TB/s HBM: 2 MiB f32 blocks already bury step overhead
    if "v6" in kind:
        return 8192       # ~1.4 TB/s HBM
    if "7" in kind:
        return 16384      # ~3.2 TB/s HBM: needs ~4x larger tiles
    return 8192


def rmse_loss(yhat, y, *, tile_rows=None):
    """RMSE = sqrt(mean((yhat - y)^2)) over all elements (PyTorch RMSELoss)."""
    assert yhat.shape == y.shape, (yhat.shape, y.shape)
    n = int(yhat.size)
    assert n > 0

    # Keep the native floating dtype end-to-end (halves HBM bytes for bf16);
    # integer inputs fall back to f32.
    if not jnp.issubdtype(yhat.dtype, jnp.floating):
        yhat = yhat.astype(jnp.float32)
    if not jnp.issubdtype(y.dtype, jnp.floating):
        y = y.astype(jnp.float32)
    if yhat.dtype != y.dtype:
        common = jnp.promote_types(yhat.dtype, y.dtype)
        yhat = yhat.astype(common)
        y = y.astype(common)

    itemsize = jnp.dtype(yhat.dtype).itemsize
    sub = max(8, 32 // itemsize)          # sublane granularity: 8/16/32 for 4/2/1 B

    yhat_f = yhat.reshape(-1)
    y_f = y.reshape(-1)

    rows = _round_up(pl.cdiv(n, LANES), sub)
    padded_n = rows * LANES
    if padded_n != n:
        # Only fires for ragged sizes: zero-pad BOTH operands so the pad
        # contributes (0-0)^2 = 0. Aligned inputs reshape for free (no copy).
        yhat_f = jnp.pad(yhat_f, (0, padded_n - n))
        y_f = jnp.pad(y_f, (0, padded_n - n))

    yhat_2d = yhat_f.reshape(rows, LANES)
    y_2d = y_f.reshape(rows, LANES)

    if tile_rows is None:
        tile_rows = _default_tile_rows()
    tile_rows = min(_round_up(max(int(tile_rows), sub), sub), rows)

    nblocks = pl.cdiv(rows, tile_rows)
    split = 2 if nblocks >= 2 else 1      # leading 'parallel' axis (v7x: 2 TCs)
    steps = pl.cdiv(nblocks, split)

    need_mask = (split * steps * tile_rows) != rows
    clamp = (split * steps) > nblocks

    def in_index(i, j):
        b = i * steps + j
        if clamp:
            b = jnp.minimum(b, nblocks - 1)   # duplicate block is masked in-kernel
        return (b, 0)

    kernel = functools.partial(
        _rmse_partial_kernel, valid_rows=rows, need_mask=need_mask)

    # 2 inputs x 2 pipeline buffers per block, plus headroom for the tiny
    # output/accumulator block and compiler scratch.
    block_bytes = tile_rows * LANES * itemsize
    vmem_limit = int(2 * 2 * block_bytes + (8 << 20))

    partials = pl.pallas_call(
        kernel,
        out_shape=jax.ShapeDtypeStruct((split, 8, LANES), jnp.float32),
        grid=(split, steps),
        in_specs=[
            pl.BlockSpec((tile_rows, LANES), in_index),
            pl.BlockSpec((tile_rows, LANES), in_index),
        ],
        out_specs=pl.BlockSpec((1, 8, LANES), lambda i, j: (i, 0, 0)),
        compiler_params=pltpu.CompilerParams(
            dimension_semantics=("parallel", "arbitrary"),
            vmem_limit_bytes=vmem_limit,
        ),
    )(yhat_2d, y_2d)

    # Tiny epilogue: reduce the (split, 8, 128) partial sums, mean over the
    # TRUE element count, sqrt.
    return jnp.sqrt(jnp.sum(partials) / n)


if __name__ == "__main__":
    key = jax.random.PRNGKey(0)
    k1, k2, k3, k4, k5, k6 = jax.random.split(key, 6)

    # Small example consistent with the module: two same-shaped tensors.
    shape = (2, 4, 16, 16)
    yhat = jax.random.normal(k1, shape, jnp.float32)
    y = jax.random.normal(k2, shape, jnp.float32)

    out = jax.block_until_ready(rmse_loss(yhat, y))
    ref = jnp.sqrt(jnp.mean((yhat - y) ** 2))
    assert out.shape == ()
    assert jnp.allclose(out, ref, atol=1e-5, rtol=1e-5), (out, ref)

    # Ragged size (not a multiple of 128) exercises the zero-padding path.
    yhat2 = jax.random.normal(k3, (3, 5, 7), jnp.float32)
    y2 = jax.random.normal(k4, (3, 5, 7), jnp.float32)
    out2 = jax.block_until_ready(rmse_loss(yhat2, y2))
    ref2 = jnp.sqrt(jnp.mean((yhat2 - y2) ** 2))
    assert jnp.allclose(out2, ref2, atol=1e-5, rtol=1e-5), (out2, ref2)

    # bf16 inputs exercise native-dtype DMA + in-kernel upcast; the size
    # (10000 rows of 128 lanes) exercises the split 'parallel' axis and the
    # in-kernel tail-row masking on every generation's default tile.
    shape3 = (80, 125, 128)
    yhat3 = jax.random.normal(k5, shape3, jnp.float32).astype(jnp.bfloat16)
    y3 = jax.random.normal(k6, shape3, jnp.float32).astype(jnp.bfloat16)
    out3 = jax.block_until_ready(rmse_loss(yhat3, y3))
    ref3 = jnp.sqrt(jnp.mean(
        (yhat3.astype(jnp.float32) - y3.astype(jnp.float32)) ** 2))
    assert jnp.allclose(out3, ref3, atol=1e-4, rtol=1e-4), (out3, ref3)

    print("KERNEL_OK")
</pallas_src>

<mosaic_0001>
module attributes {stable_mosaic.version = 11 : i64} {
  func.func @_rmse_partial_kernel(%arg0: i32, %arg1: i32, %arg2: memref<16x128xf32, #tpu.memory_space<vmem>>, %arg3: memref<16x128xf32, #tpu.memory_space<vmem>>, %arg4: memref<1x8x128xf32, #tpu.memory_space<vmem>>) attributes {dimension_semantics = [#tpu.dimension_semantics<parallel>, #tpu.dimension_semantics<arbitrary>], iteration_bounds = array<i64: 1, 1>, scalar_prefetch = 0 : i64, scratch_operands = 0 : i64, tpu.core_type = #tpu.core_type<tc>, window_params = [{transform_indices = @transform_0, window_bounds = array<i64: 16, 128>}, {transform_indices = @transform_1, window_bounds = array<i64: 16, 128>}, {transform_indices = @transform_2, window_bounds = array<i64: 1, 8, 128>}]} {
    %c0_i32 = arith.constant 0 : i32
    %0 = arith.cmpi eq, %arg1, %c0_i32 : i32
    %1 = arith.extui %0 : i1 to i32
    %c0_i32_0 = arith.constant 0 : i32
    %2 = arith.cmpi ne, %1, %c0_i32_0 : i32
    scf.if %2 {
      %cst_10 = arith.constant 0.000000e+00 : f32
      %13 = vector.broadcast %cst_10 : f32 to vector<1x8x128xf32>
      %c0_11 = arith.constant 0 : index
      %c0_12 = arith.constant 0 : index
      %c0_13 = arith.constant 0 : index
      %14 = vector.load %arg4[%c0_11, %c0_12, %c0_13] : memref<1x8x128xf32, #tpu.memory_space<vmem>>, vector<1x8x128xf32>
      tpu.vector_store %arg4[%c0_11, %c0_12, %c0_13], %13 {strides = array<i32>} : memref<1x8x128xf32, #tpu.memory_space<vmem>>, vector<1x8x128xf32>,
    } else {
    }
    %c0 = arith.constant 0 : index
    %c0_1 = arith.constant 0 : index
    %3 = vector.load %arg2[%c0, %c0_1] : memref<16x128xf32, #tpu.memory_space<vmem>>, vector<16x128xf32>
    %c0_2 = arith.constant 0 : index
    %c0_3 = arith.constant 0 : index
    %4 = vector.load %arg3[%c0_2, %c0_3] : memref<16x128xf32, #tpu.memory_space<vmem>>, vector<16x128xf32>
    %5 = arith.subf %3, %4 : vector<16x128xf32>
    %6 = arith.mulf %5, %5 : vector<16x128xf32>
    %7 = vector.shape_cast %6 : vector<16x128xf32> to vector<2x8x128xf32>
    %cst = arith.constant dense<0.000000e+00> : vector<8x128xf32>
    %8 = vector.multi_reduction <add>, %7, %cst [0] : vector<2x8x128xf32> to vector<8x128xf32>
    %c0_4 = arith.constant 0 : index
    %c0_5 = arith.constant 0 : index
    %c0_6 = arith.constant 0 : index
    %9 = vector.load %arg4[%c0_4, %c0_5, %c0_6] : memref<1x8x128xf32, #tpu.memory_space<vmem>>, vector<1x8x128xf32>
    %10 = vector.shape_cast %8 : vector<8x128xf32> to vector<1x8x128xf32>
    %11 = arith.addf %9, %10 : vector<1x8x128xf32>
    %c0_7 = arith.constant 0 : index
    %c0_8 = arith.constant 0 : index
    %c0_9 = arith.constant 0 : index
    %12 = vector.load %arg4[%c0_7, %c0_8, %c0_9] : memref<1x8x128xf32, #tpu.memory_space<vmem>>, vector<1x8x128xf32>
    tpu.vector_store %arg4[%c0_7, %c0_8, %c0_9], %11 {strides = array<i32>} : memref<1x8x128xf32, #tpu.memory_space<vmem>>, vector<1x8x128xf32>,
    return
  }
  func.func @transform_0(%arg0: i32, %arg1: i32) -> (i32, i32) {
    %c1_i32 = arith.constant 1 : i32
    %0 = arith.muli %arg0, %c1_i32 : i32
    %1 = arith.addi %0, %arg1 : i32
    %c0_i32 = arith.constant 0 : i32
    %c0_i32_0 = arith.constant 0 : i32
    return %1, %c0_i32 : i32, i32
  }
  func.func @transform_1(%arg0: i32, %arg1: i32) -> (i32, i32) {
    %c1_i32 = arith.constant 1 : i32
    %0 = arith.muli %arg0, %c1_i32 : i32
    %1 = arith.addi %0, %arg1 : i32
    %c0_i32 = arith.constant 0 : i32
    %c0_i32_0 = arith.constant 0 : i32
    return %1, %c0_i32 : i32, i32
  }
  func.func @transform_2(%arg0: i32, %arg1: i32) -> (i32, i32, i32) {
    %c0_i32 = arith.constant 0 : i32
    %c0_i32_0 = arith.constant 0 : i32
    %c0_i32_1 = arith.constant 0 : i32
    return %arg0, %c0_i32, %c0_i32_0 : i32, i32, i32
  }
}

</mosaic_0001>

<bundles_post_ra>
// kernel: tpu_custom_call.1
= control target key start
LH: loop header
LB: loop body
LE: loop exit
PB: predicated region body
PF: predicated region fallthrough
CT: control target
= control target key end

     0   :  { %7 = vsyncpa [#allocation3], 0  ;;  %s219_s0 = inlined_call_operand.hbm [shape: f32[16,128], index: 0, kind: input, shape index: {}]   ;;  %s220_s1 = inlined_call_operand.hbm [shape: f32[16,128], index: 1, kind: input, shape index: {}]   ;;  %s221_s2 = inlined_call_operand.hbm [shape: f32[1,8,128], index: 2, kind: output, shape index: {}]  }
   0x1   :  { %8 = vsyncpa [#allocation6], 0 }
   0x2   :  { %9 = vsyncpa [#allocation4], 0  ;;  %s163_s9 = smov [#allocation2]   ;;  %s91_s13 = scalar_lea.hbm %s219_s0, 256 }
   0x3   :  { %s19_s10 = sshll.u32 %s163_s9, 4  ;;  %p92_p0 = scmp.ne.s32.totalorder %s219_s0, %s91_s13  ;;  %s20_s10 = int_to_ptr.vmem [resolvable:$true] %s19_s10 }
   0x4   :  { %p95_p1 = scmp.lt.u32.totalorder %s91_s13, %s219_s0 }
   0x6   :  { %p97_p2 = pnand %p95_p1, %p92_p0 }
   0x8   :  { %100 = shalt.err (!%p97_p2)
}
   0x9   :  { %s101_s18 = scalar_lea.vmem %s20_s10, 256  ;;  %p106_p4 = scmp.lt.s32.totalorder %s20_s10, %s20_s10 }
   0xa   :  { %p102_p3 = scmp.ne.s32.totalorder %s20_s10, %s101_s18  ;;  %p107_p5 = scmp.lt.s32.totalorder %s101_s18, %s101_s18 }
   0xc   :  { %p108_p6 = por %p107_p5, %p106_p4 }
   0xe   :  { %p109_p7 = pnand %p108_p6, %p102_p3 }
  0x10   :  { %112 = shalt.err (!%p109_p7)
}
  0x11   :  { %s164_s19 = smov 128   ;;  %s165_s20 = smov 8  }
  0x12   :  { %25 = dma.hbm_to_vmem [thread:$0]  %s219_s0, 256, %s20_s10, [#allocation3], %s164_s19, %s164_s19, %s165_s20  }
  0x13   :  { %s166_s23 = smov [#allocation5]   ;;  %s113_s27 = scalar_lea.hbm %s220_s1, 256 }
  0x14   :  { %s35_s24 = sshll.u32 %s166_s23, 4  ;;  %p114_p8 = scmp.ne.s32.totalorder %s220_s1, %s113_s27  ;;  %s36_s24 = int_to_ptr.vmem [resolvable:$true] %s35_s24 }
  0x15   :  { %p117_p9 = scmp.lt.u32.totalorder %s113_s27, %s220_s1 }
  0x17   :  { %p119_p10 = pnand %p117_p9, %p114_p8 }
  0x19   :  { %122 = shalt.err (!%p119_p10)
}
  0x1a   :  { %s123_s4 = scalar_lea.vmem %s36_s24, 256  ;;  %p128_p12 = scmp.lt.s32.totalorder %s36_s24, %s36_s24 }
  0x1b   :  { %p124_p11 = scmp.ne.s32.totalorder %s36_s24, %s123_s4  ;;  %p129_p13 = scmp.lt.s32.totalorder %s123_s4, %s123_s4 }
  0x1d   :  { %p130_p0 = por %p129_p13, %p128_p12 }
  0x1f   :  { %p131_p1 = pnand %p130_p0, %p124_p11 }
  0x21   :  { %134 = shalt.err (!%p131_p1)
}
  0x22   :  { %41 = dma.hbm_to_vmem [thread:$0]  %s220_s1, 256, %s36_s24, [#allocation6], %s164_s19, %s164_s19, %s165_s20  }
  0x23   :  { %157 = dma.done.wait [#allocation3], 256  }
  0x24   :  { %158 = vsyncadd [#allocation3], 4294967040 }
  0x25   :  { %159 = dma.done.wait [#allocation6], 256  }
  0x26   :  { %160 = vsyncadd [#allocation6], 4294967040  ;;  %v57_v0 = vld [vmem:[#allocation2] sm:$0xff]  ;;  %v58_v1 = vld [vmem:[#allocation2 + $0x8] sm:$0xff]  ;;  %s167_s6 = smov [#allocation7]  }
  0x27   :  { %v59_v2 = vld [vmem:[#allocation5] sm:$0xff]  ;;  %v60_v3 = vld [vmem:[#allocation5 + $0x8] sm:$0xff]  ;;  %s75_s7 = sshll.u32 %s167_s6, 4  ;;  %s76_s7 = int_to_ptr.vmem [resolvable:$true] %s75_s7 }
  0x28   :  { %v61_v4 = vsub.f32 %v57_v0, %v59_v2  ;;  %v62_v5 = vsub.f32 %v58_v1, %v60_v3  ;;  %s135_s8 = scalar_lea.vmem %s76_s7, 128  ;;  %p140_p3 = scmp.lt.s32.totalorder %s76_s7, %s76_s7 }
  0x29   :  { %p136_p2 = scmp.ne.s32.totalorder %s76_s7, %s135_s8  ;;  %p141_p4 = scmp.lt.s32.totalorder %s135_s8, %s135_s8 }
  0x2a   :  { %v63_v6 = vmul.f32 %v61_v4, %v61_v4  ;;  %v64_v7 = vmul.f32 %v62_v5, %v62_v5 }
  0x2b   :  { %p142_p5 = por %p141_p4, %p140_p3 }
  0x2c   :  { %v65_v8 = vadd.f32 %v64_v7, %v63_v6 }
  0x2d   :  { %p143_p6 = pnand %p142_p5, %p136_p2 }
  0x2e   :  { %68 = vst [vmem:[#allocation7] sm:$0xff] %v65_v8 }
  0x2f   :  { %146 = shalt.err (!%p143_p6)
}
  0x30   :  { %s147_s10 = scalar_lea.hbm %s221_s2, 128 }
  0x31   :  { %p148_p7 = scmp.ne.s32.totalorder %s221_s2, %s147_s10  ;;  %p151_p8 = scmp.lt.u32.totalorder %s147_s10, %s221_s2 }
  0x33   :  { %p153_p9 = pnand %p151_p8, %p148_p7 }
  0x35   :  { %156 = shalt.err (!%p153_p9)
}
  0x36   :  { %78 = dma.vmem_to_hbm [thread:$0]  %s76_s7, 128, %s221_s2, [#allocation4]  }
  0x37   :  { %161 = dma.done.wait [#allocation4], 128  }
  0x38   :  { %162 = vsyncadd [#allocation4], 4294967168 }
  0x39   :  { %82 = vsyncpa [#allocation3], 1 }
  0x3a   :  { %83 = vsyncpa [#allocation6], 1 }
  0x3b   :  { %84 = vsyncpa [#allocation4], 1 }

</bundles_post_ra>
